<compile_context>
chip_gen: v6e
topology: v6e:2x2x1
jax: 0.10.0
libtpu: 0.0.40
codegen_flags: <defaults>
</compile_context>

<pallas_src>
import math

import jax
import jax.numpy as jnp
from jax.experimental import pallas as pl
from jax.experimental.pallas import tpu as pltpu


def _scale_dims(T, s):
    """Static per-scale pipeline lengths."""
    L1 = -(-T // s)          # len(range(0, T, s))
    L2 = L1 - 2              # after conv2 (kernel 3 along time)
    P1 = L2 // 2             # after first maxpool (2,1)
    L3 = P1 - 2              # after conv3
    P2 = L3 // 2             # after second maxpool (2,1)
    return L1, L2, P1, L3, P2


# ----------------------------------------------------------------------------
# Fused forward: one pallas_call for all scales, the whole batch block, the
# zero padding and the channel concatenation.
# ----------------------------------------------------------------------------
def cnn_downsampling(X, params, T):
    """X: (B, T, D) f32 -> (B, max_len, 32*S) f32."""
    B, T_, D = X.shape
    assert T_ == T
    S = (T - 1) // 9
    assert S >= 1, "time_step too short for any downsampling scale"
    dims = [_scale_dims(T, s) for s in range(1, S + 1)]
    for d in dims:
        assert d[4] >= 1, "sequence too short for RCNN"
    max_len = dims[0][4]

    f32, bf16 = jnp.float32, jnp.bfloat16

    # ---- static geometry ----------------------------------------------------
    Tp = -(-T // 8) * 8            # pad time rows so 2-D blocks are 8-aligned
    MLp = -(-max_len // 8) * 8     # pad output rows likewise
    # >= 2 grid steps when B > 1 (keeps both v7x TCs busy); the cap keeps the
    # O(BB^2) selector slabs tiny in VMEM on every generation.
    BB = 1 if B == 1 else min(16, -(-B // 2))
    Bp = -(-B // BB) * BB          # pad batch so every block is full (no OOB blocks)
    grid = (Bp // BB,)
    P1max = dims[0][2]
    Wmax = BB * Tp - 2
    Cmax = BB * P1max - 2

    # ---- fused / packed parameters and selectors (built once, outside kernel)
    w12 = jnp.zeros((S, D, 96), f32)               # conv1∘conv2 fused, 3 taps on lanes
    w3p = jnp.zeros((S, 96, 32), f32)              # conv3 im2col weights
    bp = jnp.zeros((S, 2, 32), f32)                # row 0: b12, row 1: b3
    ap = jnp.zeros((S, 2, BB * P1max, Wmax), f32)  # downsample + pool1 even/odd
    ep = jnp.zeros((S, 2, BB * MLp, Cmax), f32)    # pool2 even/odd (+ zero pad rows)

    for si, (w1, b1, w2, b2, w3, b3) in enumerate(params):
        s = si + 1
        L1, L2, P1, L3, P2 = dims[si]
        pad = max_len - P2

        for k in range(3):
            w12 = w12.at[si, :, 32 * k:32 * (k + 1)].set(w1 @ w2[k])
        bp = bp.at[si, 0].set(b1 @ (w2[0] + w2[1] + w2[2]) + b2)
        bp = bp.at[si, 1].set(b3)
        w3p = w3p.at[si].set(w3.reshape(3 * 32, 32))

        # A[par]: output row (b, j) picks the fused conv output at strided time
        # 2j+par, i.e. packed-z row b*Tp + (2j+par)*s.
        Ws = BB * Tp - 2 * s
        r = jnp.arange(BB * P1)
        bi, j = r // P1, r % P1
        col = jnp.arange(Ws)[None, :]
        for par in (0, 1):
            c = (bi * Tp + (2 * j + par) * s)[:, None]
            ap = ap.at[si, par, :BB * P1, :Ws].set((col == c).astype(f32))

        # E[par]: output row (b, r) picks conv3 row b*P1 + 2*(r-pad)+par; rows
        # with r < pad (front zero padding) or r >= max_len stay all-zero.
        Cs = BB * P1 - 2
        r = jnp.arange(BB * MLp)
        bi, t = r // MLp, r % MLp
        valid = ((t >= pad) & (t < max_len))[:, None]
        col = jnp.arange(Cs)[None, :]
        for par in (0, 1):
            c = (bi * P1 + 2 * (t - pad) + par)[:, None]
            ep = ep.at[si, par, :BB * MLp, :Cs].set(
                (valid & (col == c)).astype(f32))

    # MXU operands in bf16 (0/1 selectors stay exact), accumulation in f32.
    w12, w3p, ap, ep = (a.astype(bf16) for a in (w12, w3p, ap, ep))

    # Batch folded into the row (M) axis: (Bp*Tp, D) input slab.
    Xp = jnp.zeros((Bp, Tp, D), f32).at[:B, :T].set(X).reshape(Bp * Tp, D)

    def kernel(x_ref, w12_ref, w3_ref, b_ref, a_ref, e_ref, o_ref):
        x = x_ref[...].astype(bf16)                                   # (BB*Tp, D)
        outs = []
        for si in range(S):
            s = si + 1
            L1, L2, P1, L3, P2 = dims[si]
            Ws = BB * Tp - 2 * s
            M3 = BB * P1 - 2

            # conv1∘conv2 fused: one matmul for all three temporal taps, then
            # two unit-stride shifted adds fold the taps together.
            z = jnp.dot(x, w12_ref[si], preferred_element_type=f32)   # (BB*Tp, 96)
            zs = (z[0:Ws, 0:32] + z[s:s + Ws, 32:64]
                  + z[2 * s:2 * s + Ws, 64:96]).astype(bf16)          # (Ws, 32)

            # temporal downsampling + first maxpool: exact 0/1 selection matmuls.
            he = jnp.dot(a_ref[si, 0, :BB * P1, :Ws], zs,
                         preferred_element_type=f32)
            ho = jnp.dot(a_ref[si, 1, :BB * P1, :Ws], zs,
                         preferred_element_type=f32)
            p1 = (jnp.maximum(he, ho) + b_ref[si, 0:1, :]).astype(bf16)  # (BB*P1, 32)

            # conv3 as a single im2col matmul for the whole batch block (rows
            # straddling a batch boundary are dropped by the pool-2 selectors).
            c3 = jnp.concatenate([p1[0:M3], p1[1:M3 + 1], p1[2:M3 + 2]], axis=1)
            h3 = (jnp.dot(c3, w3_ref[si], preferred_element_type=f32)
                  + b_ref[si, 1:2, :]).astype(bf16)                   # (M3, 32)

            # second maxpool + front zero padding (folded into the selectors).
            oe = jnp.dot(e_ref[si, 0, :, :M3], h3, preferred_element_type=f32)
            oo = jnp.dot(e_ref[si, 1, :, :M3], h3, preferred_element_type=f32)
            outs.append(jnp.maximum(oe, oo))                          # (BB*MLp, 32)

        # one lane-dense store per grid step (32*S lanes, all scales at once)
        o_ref[...] = jnp.concatenate(outs, axis=1) if S > 1 else outs[0]

    out2d = pl.pallas_call(
        kernel,
        out_shape=jax.ShapeDtypeStruct((Bp * MLp, 32 * S), jnp.float32),
        grid=grid,
        in_specs=[
            pl.BlockSpec((BB * Tp, D), lambda i: (i, 0)),
            pl.BlockSpec(w12.shape, lambda i: (0, 0, 0)),
            pl.BlockSpec(w3p.shape, lambda i: (0, 0, 0)),
            pl.BlockSpec(bp.shape, lambda i: (0, 0, 0)),
            pl.BlockSpec(ap.shape, lambda i: (0, 0, 0, 0)),
            pl.BlockSpec(ep.shape, lambda i: (0, 0, 0, 0)),
        ],
        out_specs=pl.BlockSpec((BB * MLp, 32 * S), lambda i: (i, 0)),
        compiler_params=pltpu.CompilerParams(
            dimension_semantics=("parallel",)),
    )(Xp, w12, w3p, bp, ap, ep)

    return out2d.reshape(Bp, MLp, 32 * S)[:B, :max_len]


# ----------------------------------------------------------------------------
# Parameter init (deterministic, PyTorch-default-style uniform bounds).
# w1 (D,16); w2 (3,16,32) with w2[k] == Conv2d weight[:, :, k, 0].T;
# w3 (3,32,32) analogously.
# ----------------------------------------------------------------------------
def init_params(key, D, T):
    S = (T - 1) // 9

    def u(k, shape, fan_in):
        bound = 1.0 / math.sqrt(fan_in)
        return jax.random.uniform(k, shape, jnp.float32, -bound, bound)

    params = []
    for s in range(S):
        ks = jax.random.split(jax.random.fold_in(key, s), 6)
        w1 = u(ks[0], (D, 16), 1 * 1 * D)
        b1 = u(ks[1], (16,), 1 * 1 * D)
        w2 = u(ks[2], (3, 16, 32), 16 * 3)
        b2 = u(ks[3], (32,), 16 * 3)
        w3 = u(ks[4], (3, 32, 32), 32 * 3)
        b3 = u(ks[5], (32,), 32 * 3)
        params.append((w1, b1, w2, b2, w3, b3))
    return params


# ----------------------------------------------------------------------------
# Pure-JAX reference (same math, no Pallas) for verification.
# ----------------------------------------------------------------------------
def rcnn_ref(x, w1, b1, w2, b2, w3, b3):
    h1 = jnp.einsum("bld,df->blf", x, w1) + b1
    L2 = h1.shape[1] - 2
    h2 = sum(jnp.einsum("blf,fg->blg", h1[:, k:k + L2], w2[k])
             for k in range(3)) + b2
    P1 = L2 // 2
    h2p = jnp.maximum(h2[:, 0:2 * P1:2], h2[:, 1:2 * P1:2])
    L3 = P1 - 2
    h3 = sum(jnp.einsum("blf,fg->blg", h2p[:, k:k + L3], w3[k])
             for k in range(3)) + b3
    P2 = L3 // 2
    return jnp.maximum(h3[:, 0:2 * P2:2], h3[:, 1:2 * P2:2])


def cnn_downsampling_ref(X, params, T):
    S = (T - 1) // 9
    outs = []
    max_len = None
    for s in range(1, S + 1):
        y = rcnn_ref(X[:, ::s, :], *params[s - 1])
        if s == 1:
            max_len = y.shape[1]
            outs.append(y)
        else:
            pad = jnp.zeros((y.shape[0], max_len - y.shape[1], y.shape[2]),
                            dtype=y.dtype)
            outs.append(jnp.concatenate([pad, y], axis=1))
    return jnp.concatenate(outs, axis=2)


if __name__ == "__main__":
    B, T, D = 2, 28, 8            # S = (T - 1) // 9 = 3 downsampling scales
    key = jax.random.PRNGKey(0)
    kx, kp = jax.random.split(key)

    X = jax.random.normal(kx, (B, T, D), dtype=jnp.float32)
    params = init_params(kp, D, T)

    out = jax.block_until_ready(cnn_downsampling(X, params, T))

    ref = cnn_downsampling_ref(X, params, T)
    assert out.shape == ref.shape == (B, 5, 32 * 3), (out.shape, ref.shape)
    max_err = float(jnp.max(jnp.abs(out - ref)))
    assert max_err < 5e-2, max_err   # bf16 MXU operands, f32 accumulation

    print("KERNEL_OK")
</pallas_src>

<mosaic_0001>
module attributes {stable_mosaic.version = 11 : i64} {
  func.func @kernel(%arg0: i32, %arg1: memref<32x8xf32, #tpu.memory_space<vmem>>, %arg2: memref<3x8x96xbf16, #tpu.memory_space<vmem>>, %arg3: memref<3x96x32xbf16, #tpu.memory_space<vmem>>, %arg4: memref<3x2x32xf32, #tpu.memory_space<vmem>>, %arg5: memref<3x2x13x30xbf16, #tpu.memory_space<vmem>>, %arg6: memref<3x2x8x11xbf16, #tpu.memory_space<vmem>>, %arg7: memref<8x96xf32, #tpu.memory_space<vmem>>) attributes {dimension_semantics = [#tpu.dimension_semantics<parallel>], iteration_bounds = array<i64: 2>, scalar_prefetch = 0 : i64, scratch_operands = 0 : i64, tpu.core_type = #tpu.core_type<tc>, window_params = [{transform_indices = @transform_0, window_bounds = array<i64: 32, 8>}, {pipeline_mode = #tpu.pipeline_mode<synchronous>, transform_indices = @transform_1, window_bounds = array<i64: 3, 8, 96>}, {pipeline_mode = #tpu.pipeline_mode<synchronous>, transform_indices = @transform_2, window_bounds = array<i64: 3, 96, 32>}, {pipeline_mode = #tpu.pipeline_mode<synchronous>, transform_indices = @transform_3, window_bounds = array<i64: 3, 2, 32>}, {pipeline_mode = #tpu.pipeline_mode<synchronous>, transform_indices = @transform_4, window_bounds = array<i64: 3, 2, 13, 30>}, {pipeline_mode = #tpu.pipeline_mode<synchronous>, transform_indices = @transform_5, window_bounds = array<i64: 3, 2, 8, 11>}, {transform_indices = @transform_6, window_bounds = array<i64: 8, 96>}]} {
    %c0 = arith.constant 0 : index
    %c0_0 = arith.constant 0 : index
    %0 = vector.load %arg1[%c0, %c0_0] : memref<32x8xf32, #tpu.memory_space<vmem>>, vector<32x8xf32>
    %1 = arith.truncf %0 : vector<32x8xf32> to vector<32x8xbf16>
    %c0_1 = arith.constant 0 : index
    %c0_2 = arith.constant 0 : index
    %c0_3 = arith.constant 0 : index
    %2 = vector.load %arg2[%c0_1, %c0_2, %c0_3] : memref<3x8x96xbf16, #tpu.memory_space<vmem>>, vector<1x8x96xbf16>
    %3 = vector.shape_cast %2 : vector<1x8x96xbf16> to vector<8x96xbf16>
    %cst = arith.constant dense<0.000000e+00> : vector<32x96xf32>
    %4 = tpu.matmul %1, %3, %cst {dimension_numbers = #tpu.dot_dimension_numbers<[1], [0], [0], [1], [0, 0, 1, 1], [], []>} : vector<32x8xbf16>, vector<8x96xbf16>, vector<32x96xf32> -> vector<32x96xf32>
    %5 = vector.extract_strided_slice %4 {offsets = [0, 0], sizes = [30, 32], strides = [1, 1]} : vector<32x96xf32> to vector<30x32xf32>
    %6 = vector.extract_strided_slice %4 {offsets = [1, 32], sizes = [30, 32], strides = [1, 1]} : vector<32x96xf32> to vector<30x32xf32>
    %7 = arith.addf %5, %6 : vector<30x32xf32>
    %8 = vector.extract_strided_slice %4 {offsets = [2, 64], sizes = [30, 32], strides = [1, 1]} : vector<32x96xf32> to vector<30x32xf32>
    %9 = arith.addf %7, %8 : vector<30x32xf32>
    %10 = arith.truncf %9 : vector<30x32xf32> to vector<30x32xbf16>
    %c0_4 = arith.constant 0 : index
    %c0_5 = arith.constant 0 : index
    %c0_6 = arith.constant 0 : index
    %c0_7 = arith.constant 0 : index
    %11 = vector.load %arg5[%c0_4, %c0_5, %c0_6, %c0_7] : memref<3x2x13x30xbf16, #tpu.memory_space<vmem>>, vector<1x1x13x30xbf16>
    %12 = vector.shape_cast %11 : vector<1x1x13x30xbf16> to vector<13x30xbf16>
    %cst_8 = arith.constant dense<0.000000e+00> : vector<13x32xf32>
    %13 = tpu.matmul %12, %10, %cst_8 {dimension_numbers = #tpu.dot_dimension_numbers<[1], [0], [0], [1], [0, 0, 1, 1], [], []>} : vector<13x30xbf16>, vector<30x32xbf16>, vector<13x32xf32> -> vector<13x32xf32>
    %c0_9 = arith.constant 0 : index
    %c1 = arith.constant 1 : index
    %c0_10 = arith.constant 0 : index
    %c0_11 = arith.constant 0 : index
    %14 = vector.load %arg5[%c0_9, %c1, %c0_10, %c0_11] : memref<3x2x13x30xbf16, #tpu.memory_space<vmem>>, vector<1x1x13x30xbf16>
    %15 = vector.shape_cast %14 : vector<1x1x13x30xbf16> to vector<13x30xbf16>
    %cst_12 = arith.constant dense<0.000000e+00> : vector<13x32xf32>
    %16 = tpu.matmul %15, %10, %cst_12 {dimension_numbers = #tpu.dot_dimension_numbers<[1], [0], [0], [1], [0, 0, 1, 1], [], []>} : vector<13x30xbf16>, vector<30x32xbf16>, vector<13x32xf32> -> vector<13x32xf32>
    %17 = arith.maximumf %13, %16 : vector<13x32xf32>
    %c0_13 = arith.constant 0 : index
    %c0_14 = arith.constant 0 : index
    %c0_15 = arith.constant 0 : index
    %18 = vector.load %arg4[%c0_13, %c0_14, %c0_15] : memref<3x2x32xf32, #tpu.memory_space<vmem>>, vector<1x1x32xf32>
    %19 = vector.shape_cast %18 : vector<1x1x32xf32> to vector<1x32xf32>
    %20 = vector.broadcast %19 : vector<1x32xf32> to vector<13x32xf32>
    %21 = arith.addf %17, %20 : vector<13x32xf32>
    %22 = arith.truncf %21 : vector<13x32xf32> to vector<13x32xbf16>
    %23 = vector.extract_strided_slice %22 {offsets = [0, 0], sizes = [11, 32], strides = [1, 1]} : vector<13x32xbf16> to vector<11x32xbf16>
    %24 = vector.extract_strided_slice %22 {offsets = [1, 0], sizes = [11, 32], strides = [1, 1]} : vector<13x32xbf16> to vector<11x32xbf16>
    %25 = vector.extract_strided_slice %22 {offsets = [2, 0], sizes = [11, 32], strides = [1, 1]} : vector<13x32xbf16> to vector<11x32xbf16>
    %26 = tpu.concatenate %23, %24, %25 in 1 : vector<11x32xbf16>, vector<11x32xbf16>, vector<11x32xbf16> -> vector<11x96xbf16>
    %c0_16 = arith.constant 0 : index
    %c0_17 = arith.constant 0 : index
    %c0_18 = arith.constant 0 : index
    %27 = vector.load %arg3[%c0_16, %c0_17, %c0_18] : memref<3x96x32xbf16, #tpu.memory_space<vmem>>, vector<1x96x32xbf16>
    %28 = vector.shape_cast %27 : vector<1x96x32xbf16> to vector<96x32xbf16>
    %cst_19 = arith.constant dense<0.000000e+00> : vector<11x32xf32>
    %29 = tpu.matmul %26, %28, %cst_19 {dimension_numbers = #tpu.dot_dimension_numbers<[1], [0], [0], [1], [0, 0, 1, 1], [], []>} : vector<11x96xbf16>, vector<96x32xbf16>, vector<11x32xf32> -> vector<11x32xf32>
    %c0_20 = arith.constant 0 : index
    %c1_21 = arith.constant 1 : index
    %c0_22 = arith.constant 0 : index
    %30 = vector.load %arg4[%c0_20, %c1_21, %c0_22] : memref<3x2x32xf32, #tpu.memory_space<vmem>>, vector<1x1x32xf32>
    %31 = vector.shape_cast %30 : vector<1x1x32xf32> to vector<1x32xf32>
    %32 = vector.broadcast %31 : vector<1x32xf32> to vector<11x32xf32>
    %33 = arith.addf %29, %32 : vector<11x32xf32>
    %34 = arith.truncf %33 : vector<11x32xf32> to vector<11x32xbf16>
    %c0_23 = arith.constant 0 : index
    %c0_24 = arith.constant 0 : index
    %c0_25 = arith.constant 0 : index
    %c0_26 = arith.constant 0 : index
    %35 = vector.load %arg6[%c0_23, %c0_24, %c0_25, %c0_26] : memref<3x2x8x11xbf16, #tpu.memory_space<vmem>>, vector<1x1x8x11xbf16>
    %36 = vector.shape_cast %35 : vector<1x1x8x11xbf16> to vector<8x11xbf16>
    %cst_27 = arith.constant dense<0.000000e+00> : vector<8x32xf32>
    %37 = tpu.matmul %36, %34, %cst_27 {dimension_numbers = #tpu.dot_dimension_numbers<[1], [0], [0], [1], [0, 0, 1, 1], [], []>} : vector<8x11xbf16>, vector<11x32xbf16>, vector<8x32xf32> -> vector<8x32xf32>
    %c0_28 = arith.constant 0 : index
    %c1_29 = arith.constant 1 : index
    %c0_30 = arith.constant 0 : index
    %c0_31 = arith.constant 0 : index
    %38 = vector.load %arg6[%c0_28, %c1_29, %c0_30, %c0_31] : memref<3x2x8x11xbf16, #tpu.memory_space<vmem>>, vector<1x1x8x11xbf16>
    %39 = vector.shape_cast %38 : vector<1x1x8x11xbf16> to vector<8x11xbf16>
    %cst_32 = arith.constant dense<0.000000e+00> : vector<8x32xf32>
    %40 = tpu.matmul %39, %34, %cst_32 {dimension_numbers = #tpu.dot_dimension_numbers<[1], [0], [0], [1], [0, 0, 1, 1], [], []>} : vector<8x11xbf16>, vector<11x32xbf16>, vector<8x32xf32> -> vector<8x32xf32>
    %41 = arith.maximumf %37, %40 : vector<8x32xf32>
    %c1_33 = arith.constant 1 : index
    %c0_34 = arith.constant 0 : index
    %c0_35 = arith.constant 0 : index
    %42 = vector.load %arg2[%c1_33, %c0_34, %c0_35] : memref<3x8x96xbf16, #tpu.memory_space<vmem>>, vector<1x8x96xbf16>
    %43 = vector.shape_cast %42 : vector<1x8x96xbf16> to vector<8x96xbf16>
    %cst_36 = arith.constant dense<0.000000e+00> : vector<32x96xf32>
    %44 = tpu.matmul %1, %43, %cst_36 {dimension_numbers = #tpu.dot_dimension_numbers<[1], [0], [0], [1], [0, 0, 1, 1], [], []>} : vector<32x8xbf16>, vector<8x96xbf16>, vector<32x96xf32> -> vector<32x96xf32>
    %45 = vector.extract_strided_slice %44 {offsets = [0, 0], sizes = [28, 32], strides = [1, 1]} : vector<32x96xf32> to vector<28x32xf32>
    %46 = vector.extract_strided_slice %44 {offsets = [2, 32], sizes = [28, 32], strides = [1, 1]} : vector<32x96xf32> to vector<28x32xf32>
    %47 = arith.addf %45, %46 : vector<28x32xf32>
    %48 = vector.extract_strided_slice %44 {offsets = [4, 64], sizes = [28, 32], strides = [1, 1]} : vector<32x96xf32> to vector<28x32xf32>
    %49 = arith.addf %47, %48 : vector<28x32xf32>
    %50 = arith.truncf %49 : vector<28x32xf32> to vector<28x32xbf16>
    %c1_37 = arith.constant 1 : index
    %c0_38 = arith.constant 0 : index
    %c0_39 = arith.constant 0 : index
    %c0_40 = arith.constant 0 : index
    %51 = vector.load %arg5[%c1_37, %c0_38, %c0_39, %c0_40] : memref<3x2x13x30xbf16, #tpu.memory_space<vmem>>, vector<1x1x6x28xbf16>
    %52 = vector.shape_cast %51 : vector<1x1x6x28xbf16> to vector<6x28xbf16>
    %cst_41 = arith.constant dense<0.000000e+00> : vector<6x32xf32>
    %53 = tpu.matmul %52, %50, %cst_41 {dimension_numbers = #tpu.dot_dimension_numbers<[1], [0], [0], [1], [0, 0, 1, 1], [], []>} : vector<6x28xbf16>, vector<28x32xbf16>, vector<6x32xf32> -> vector<6x32xf32>
    %c1_42 = arith.constant 1 : index
    %c1_43 = arith.constant 1 : index
    %c0_44 = arith.constant 0 : index
    %c0_45 = arith.constant 0 : index
    %54 = vector.load %arg5[%c1_42, %c1_43, %c0_44, %c0_45] : memref<3x2x13x30xbf16, #tpu.memory_space<vmem>>, vector<1x1x6x28xbf16>
    %55 = vector.shape_cast %54 : vector<1x1x6x28xbf16> to vector<6x28xbf16>
    %cst_46 = arith.constant dense<0.000000e+00> : vector<6x32xf32>
    %56 = tpu.matmul %55, %50, %cst_46 {dimension_numbers = #tpu.dot_dimension_numbers<[1], [0], [0], [1], [0, 0, 1, 1], [], []>} : vector<6x28xbf16>, vector<28x32xbf16>, vector<6x32xf32> -> vector<6x32xf32>
    %57 = arith.maximumf %53, %56 : vector<6x32xf32>
    %c1_47 = arith.constant 1 : index
    %c0_48 = arith.constant 0 : index
    %c0_49 = arith.constant 0 : index
    %58 = vector.load %arg4[%c1_47, %c0_48, %c0_49] : memref<3x2x32xf32, #tpu.memory_space<vmem>>, vector<1x1x32xf32>
    %59 = vector.shape_cast %58 : vector<1x1x32xf32> to vector<1x32xf32>
    %60 = vector.broadcast %59 : vector<1x32xf32> to vector<6x32xf32>
    %61 = arith.addf %57, %60 : vector<6x32xf32>
    %62 = arith.truncf %61 : vector<6x32xf32> to vector<6x32xbf16>
    %63 = vector.extract_strided_slice %62 {offsets = [0, 0], sizes = [4, 32], strides = [1, 1]} : vector<6x32xbf16> to vector<4x32xbf16>
    %64 = vector.extract_strided_slice %62 {offsets = [1, 0], sizes = [4, 32], strides = [1, 1]} : vector<6x32xbf16> to vector<4x32xbf16>
    %65 = vector.extract_strided_slice %62 {offsets = [2, 0], sizes = [4, 32], strides = [1, 1]} : vector<6x32xbf16> to vector<4x32xbf16>
    %66 = tpu.concatenate %63, %64, %65 in 1 : vector<4x32xbf16>, vector<4x32xbf16>, vector<4x32xbf16> -> vector<4x96xbf16>
    %c1_50 = arith.constant 1 : index
    %c0_51 = arith.constant 0 : index
    %c0_52 = arith.constant 0 : index
    %67 = vector.load %arg3[%c1_50, %c0_51, %c0_52] : memref<3x96x32xbf16, #tpu.memory_space<vmem>>, vector<1x96x32xbf16>
    %68 = vector.shape_cast %67 : vector<1x96x32xbf16> to vector<96x32xbf16>
    %cst_53 = arith.constant dense<0.000000e+00> : vector<4x32xf32>
    %69 = tpu.matmul %66, %68, %cst_53 {dimension_numbers = #tpu.dot_dimension_numbers<[1], [0], [0], [1], [0, 0, 1, 1], [], []>} : vector<4x96xbf16>, vector<96x32xbf16>, vector<4x32xf32> -> vector<4x32xf32>
    %c1_54 = arith.constant 1 : index
    %c1_55 = arith.constant 1 : index
    %c0_56 = arith.constant 0 : index
    %70 = vector.load %arg4[%c1_54, %c1_55, %c0_56] : memref<3x2x32xf32, #tpu.memory_space<vmem>>, vector<1x1x32xf32>
    %71 = vector.shape_cast %70 : vector<1x1x32xf32> to vector<1x32xf32>
    %72 = vector.broadcast %71 : vector<1x32xf32> to vector<4x32xf32>
    %73 = arith.addf %69, %72 : vector<4x32xf32>
    %74 = arith.truncf %73 : vector<4x32xf32> to vector<4x32xbf16>
    %c1_57 = arith.constant 1 : index
    %c0_58 = arith.constant 0 : index
    %c0_59 = arith.constant 0 : index
    %c0_60 = arith.constant 0 : index
    %75 = vector.load %arg6[%c1_57, %c0_58, %c0_59, %c0_60] : memref<3x2x8x11xbf16, #tpu.memory_space<vmem>>, vector<1x1x8x4xbf16>
    %76 = vector.shape_cast %75 : vector<1x1x8x4xbf16> to vector<8x4xbf16>
    %cst_61 = arith.constant dense<0.000000e+00> : vector<8x32xf32>
    %77 = tpu.matmul %76, %74, %cst_61 {dimension_numbers = #tpu.dot_dimension_numbers<[1], [0], [0], [1], [0, 0, 1, 1], [], []>} : vector<8x4xbf16>, vector<4x32xbf16>, vector<8x32xf32> -> vector<8x32xf32>
    %c1_62 = arith.constant 1 : index
    %c1_63 = arith.constant 1 : index
    %c0_64 = arith.constant 0 : index
    %c0_65 = arith.constant 0 : index
    %78 = vector.load %arg6[%c1_62, %c1_63, %c0_64, %c0_65] : memref<3x2x8x11xbf16, #tpu.memory_space<vmem>>, vector<1x1x8x4xbf16>
    %79 = vector.shape_cast %78 : vector<1x1x8x4xbf16> to vector<8x4xbf16>
    %cst_66 = arith.constant dense<0.000000e+00> : vector<8x32xf32>
    %80 = tpu.matmul %79, %74, %cst_66 {dimension_numbers = #tpu.dot_dimension_numbers<[1], [0], [0], [1], [0, 0, 1, 1], [], []>} : vector<8x4xbf16>, vector<4x32xbf16>, vector<8x32xf32> -> vector<8x32xf32>
    %81 = arith.maximumf %77, %80 : vector<8x32xf32>
    %c2 = arith.constant 2 : index
    %c0_67 = arith.constant 0 : index
    %c0_68 = arith.constant 0 : index
    %82 = vector.load %arg2[%c2, %c0_67, %c0_68] : memref<3x8x96xbf16, #tpu.memory_space<vmem>>, vector<1x8x96xbf16>
    %83 = vector.shape_cast %82 : vector<1x8x96xbf16> to vector<8x96xbf16>
    %cst_69 = arith.constant dense<0.000000e+00> : vector<32x96xf32>
    %84 = tpu.matmul %1, %83, %cst_69 {dimension_numbers = #tpu.dot_dimension_numbers<[1], [0], [0], [1], [0, 0, 1, 1], [], []>} : vector<32x8xbf16>, vector<8x96xbf16>, vector<32x96xf32> -> vector<32x96xf32>
    %85 = vector.extract_strided_slice %84 {offsets = [0, 0], sizes = [26, 32], strides = [1, 1]} : vector<32x96xf32> to vector<26x32xf32>
    %86 = vector.extract_strided_slice %84 {offsets = [3, 32], sizes = [26, 32], strides = [1, 1]} : vector<32x96xf32> to vector<26x32xf32>
    %87 = arith.addf %85, %86 : vector<26x32xf32>
    %88 = vector.extract_strided_slice %84 {offsets = [6, 64], sizes = [26, 32], strides = [1, 1]} : vector<32x96xf32> to vector<26x32xf32>
    %89 = arith.addf %87, %88 : vector<26x32xf32>
    %90 = arith.truncf %89 : vector<26x32xf32> to vector<26x32xbf16>
    %c2_70 = arith.constant 2 : index
    %c0_71 = arith.constant 0 : index
    %c0_72 = arith.constant 0 : index
    %c0_73 = arith.constant 0 : index
    %91 = vector.load %arg5[%c2_70, %c0_71, %c0_72, %c0_73] : memref<3x2x13x30xbf16, #tpu.memory_space<vmem>>, vector<1x1x4x26xbf16>
    %92 = vector.shape_cast %91 : vector<1x1x4x26xbf16> to vector<4x26xbf16>
    %cst_74 = arith.constant dense<0.000000e+00> : vector<4x32xf32>
    %93 = tpu.matmul %92, %90, %cst_74 {dimension_numbers = #tpu.dot_dimension_numbers<[1], [0], [0], [1], [0, 0, 1, 1], [], []>} : vector<4x26xbf16>, vector<26x32xbf16>, vector<4x32xf32> -> vector<4x32xf32>
    %c2_75 = arith.constant 2 : index
    %c1_76 = arith.constant 1 : index
    %c0_77 = arith.constant 0 : index
    %c0_78 = arith.constant 0 : index
    %94 = vector.load %arg5[%c2_75, %c1_76, %c0_77, %c0_78] : memref<3x2x13x30xbf16, #tpu.memory_space<vmem>>, vector<1x1x4x26xbf16>
    %95 = vector.shape_cast %94 : vector<1x1x4x26xbf16> to vector<4x26xbf16>
    %cst_79 = arith.constant dense<0.000000e+00> : vector<4x32xf32>
    %96 = tpu.matmul %95, %90, %cst_79 {dimension_numbers = #tpu.dot_dimension_numbers<[1], [0], [0], [1], [0, 0, 1, 1], [], []>} : vector<4x26xbf16>, vector<26x32xbf16>, vector<4x32xf32> -> vector<4x32xf32>
    %97 = arith.maximumf %93, %96 : vector<4x32xf32>
    %c2_80 = arith.constant 2 : index
    %c0_81 = arith.constant 0 : index
    %c0_82 = arith.constant 0 : index
    %98 = vector.load %arg4[%c2_80, %c0_81, %c0_82] : memref<3x2x32xf32, #tpu.memory_space<vmem>>, vector<1x1x32xf32>
    %99 = vector.shape_cast %98 : vector<1x1x32xf32> to vector<1x32xf32>
    %100 = vector.broadcast %99 : vector<1x32xf32> to vector<4x32xf32>
    %101 = arith.addf %97, %100 : vector<4x32xf32>
    %102 = arith.truncf %101 : vector<4x32xf32> to vector<4x32xbf16>
    %103 = vector.extract_strided_slice %102 {offsets = [0, 0], sizes = [2, 32], strides = [1, 1]} : vector<4x32xbf16> to vector<2x32xbf16>
    %104 = vector.extract_strided_slice %102 {offsets = [1, 0], sizes = [2, 32], strides = [1, 1]} : vector<4x32xbf16> to vector<2x32xbf16>
    %105 = vector.extract_strided_slice %102 {offsets = [2, 0], sizes = [2, 32], strides = [1, 1]} : vector<4x32xbf16> to vector<2x32xbf16>
    %106 = tpu.concatenate %103, %104, %105 in 1 : vector<2x32xbf16>, vector<2x32xbf16>, vector<2x32xbf16> -> vector<2x96xbf16>
    %c2_83 = arith.constant 2 : index
    %c0_84 = arith.constant 0 : index
    %c0_85 = arith.constant 0 : index
    %107 = vector.load %arg3[%c2_83, %c0_84, %c0_85] : memref<3x96x32xbf16, #tpu.memory_space<vmem>>, vector<1x96x32xbf16>
    %108 = vector.shape_cast %107 : vector<1x96x32xbf16> to vector<96x32xbf16>
    %cst_86 = arith.constant dense<0.000000e+00> : vector<2x32xf32>
    %109 = tpu.matmul %106, %108, %cst_86 {dimension_numbers = #tpu.dot_dimension_numbers<[1], [0], [0], [1], [0, 0, 1, 1], [], []>} : vector<2x96xbf16>, vector<96x32xbf16>, vector<2x32xf32> -> vector<2x32xf32>
    %c2_87 = arith.constant 2 : index
    %c1_88 = arith.constant 1 : index
    %c0_89 = arith.constant 0 : index
    %110 = vector.load %arg4[%c2_87, %c1_88, %c0_89] : memref<3x2x32xf32, #tpu.memory_space<vmem>>, vector<1x1x32xf32>
    %111 = vector.shape_cast %110 : vector<1x1x32xf32> to vector<1x32xf32>
    %112 = vector.broadcast %111 : vector<1x32xf32> to vector<2x32xf32>
    %113 = arith.addf %109, %112 : vector<2x32xf32>
    %114 = arith.truncf %113 : vector<2x32xf32> to vector<2x32xbf16>
    %c2_90 = arith.constant 2 : index
    %c0_91 = arith.constant 0 : index
    %c0_92 = arith.constant 0 : index
    %c0_93 = arith.constant 0 : index
    %115 = vector.load %arg6[%c2_90, %c0_91, %c0_92, %c0_93] : memref<3x2x8x11xbf16, #tpu.memory_space<vmem>>, vector<1x1x8x2xbf16>
    %116 = vector.shape_cast %115 : vector<1x1x8x2xbf16> to vector<8x2xbf16>
    %cst_94 = arith.constant dense<0.000000e+00> : vector<8x32xf32>
    %117 = tpu.matmul %116, %114, %cst_94 {dimension_numbers = #tpu.dot_dimension_numbers<[1], [0], [0], [1], [0, 0, 1, 1], [], []>} : vector<8x2xbf16>, vector<2x32xbf16>, vector<8x32xf32> -> vector<8x32xf32>
    %c2_95 = arith.constant 2 : index
    %c1_96 = arith.constant 1 : index
    %c0_97 = arith.constant 0 : index
    %c0_98 = arith.constant 0 : index
    %118 = vector.load %arg6[%c2_95, %c1_96, %c0_97, %c0_98] : memref<3x2x8x11xbf16, #tpu.memory_space<vmem>>, vector<1x1x8x2xbf16>
    %119 = vector.shape_cast %118 : vector<1x1x8x2xbf16> to vector<8x2xbf16>
    %cst_99 = arith.constant dense<0.000000e+00> : vector<8x32xf32>
    %120 = tpu.matmul %119, %114, %cst_99 {dimension_numbers = #tpu.dot_dimension_numbers<[1], [0], [0], [1], [0, 0, 1, 1], [], []>} : vector<8x2xbf16>, vector<2x32xbf16>, vector<8x32xf32> -> vector<8x32xf32>
    %121 = arith.maximumf %117, %120 : vector<8x32xf32>
    %122 = tpu.concatenate %41, %81, %121 in 1 : vector<8x32xf32>, vector<8x32xf32>, vector<8x32xf32> -> vector<8x96xf32>
    %c0_100 = arith.constant 0 : index
    %c0_101 = arith.constant 0 : index
    %123 = vector.load %arg7[%c0_100, %c0_101] : memref<8x96xf32, #tpu.memory_space<vmem>>, vector<8x96xf32>
    tpu.vector_store %arg7[%c0_100, %c0_101], %122 {strides = array<i32>} : memref<8x96xf32, #tpu.memory_space<vmem>>, vector<8x96xf32>,
    return
  }
  func.func @transform_0(%arg0: i32) -> (i32, i32) {
    %c0_i32 = arith.constant 0 : i32
    %c0_i32_0 = arith.constant 0 : i32
    return %arg0, %c0_i32 : i32, i32
  }
  func.func @transform_1(%arg0: i32) -> (i32, i32, i32) {
    %c0_i32 = arith.constant 0 : i32
    %c0_i32_0 = arith.constant 0 : i32
    %c0_i32_1 = arith.constant 0 : i32
    %c0_i32_2 = arith.constant 0 : i32
    return %c0_i32, %c0_i32_0, %c0_i32_1 : i32, i32, i32
  }
  func.func @transform_2(%arg0: i32) -> (i32, i32, i32) {
    %c0_i32 = arith.constant 0 : i32
    %c0_i32_0 = arith.constant 0 : i32
    %c0_i32_1 = arith.constant 0 : i32
    %c0_i32_2 = arith.constant 0 : i32
    return %c0_i32, %c0_i32_0, %c0_i32_1 : i32, i32, i32
  }
  func.func @transform_3(%arg0: i32) -> (i32, i32, i32) {
    %c0_i32 = arith.constant 0 : i32
    %c0_i32_0 = arith.constant 0 : i32
    %c0_i32_1 = arith.constant 0 : i32
    %c0_i32_2 = arith.constant 0 : i32
    return %c0_i32, %c0_i32_0, %c0_i32_1 : i32, i32, i32
  }
  func.func @transform_4(%arg0: i32) -> (i32, i32, i32, i32) {
    %c0_i32 = arith.constant 0 : i32
    %c0_i32_0 = arith.constant 0 : i32
    %c0_i32_1 = arith.constant 0 : i32
    %c0_i32_2 = arith.constant 0 : i32
    %c0_i32_3 = arith.constant 0 : i32
    return %c0_i32, %c0_i32_0, %c0_i32_1, %c0_i32_2 : i32, i32, i32, i32
  }
  func.func @transform_5(%arg0: i32) -> (i32, i32, i32, i32) {
    %c0_i32 = arith.constant 0 : i32
    %c0_i32_0 = arith.constant 0 : i32
    %c0_i32_1 = arith.constant 0 : i32
    %c0_i32_2 = arith.constant 0 : i32
    %c0_i32_3 = arith.constant 0 : i32
    return %c0_i32, %c0_i32_0, %c0_i32_1, %c0_i32_2 : i32, i32, i32, i32
  }
  func.func @transform_6(%arg0: i32) -> (i32, i32) {
    %c0_i32 = arith.constant 0 : i32
    %c0_i32_0 = arith.constant 0 : i32
    return %arg0, %c0_i32 : i32, i32
  }
}

</mosaic_0001>

<bundles_post_ra>
// kernel: tpu_custom_call.1
= control target key start
LH: loop header
LB: loop body
LE: loop exit
PB: predicated region body
PF: predicated region fallthrough
CT: control target
= control target key end

     0   :  { %11 = vsyncpa [#allocation3], 0  ;;  %s2491_s0 = inlined_call_operand.vmem [shape: f32[64,8], index: 0, kind: input, shape index: {}]   ;;  %s2492_s1 = inlined_call_operand.vmem [shape: bf16[3,8,96], index: 1, kind: input, shape index: {}]   ;;  %s2493_s2 = inlined_call_operand.vmem [shape: bf16[3,96,32], index: 2, kind: input, shape index: {}]   ;;  %s2494_s3 = inlined_call_operand.vmem [shape: f32[3,2,32], index: 3, kind: input, shape index: {}]   ;;  %s2495_s4 = inlined_call_operand.vmem [shape: bf16[3,2,13,30], index: 4, kind: input, shape index: {}]   ;;  %s2496_s5 = inlined_call_operand.vmem [shape: bf16[3,2,8,11], index: 5, kind: input, shape index: {}]   ;;  %s2497_s6 = inlined_call_operand.hbm [shape: f32[16,96], index: 6, kind: output, shape index: {}]  }
   0x1   :  { %13 = vsyncpa [#allocation3 + $0x1], 0  ;;  %s2108_s21 = smov 0   ;;  %s2110_s22 = smov 0  }
   0x2   :  { %s2112_s23 = smov 0   ;;  %s2114_s24 = smov 0  }
   0x3 LB: > { %s2129_s25 = sadd.s32 4294967295, %s2064_s24   ;;  %s1627_s26 = sadd.s32 4294967294, %s2064_s24   ;;  %s2064_s24 = sphi %s2114_s24, %s2503_s24   ;;  %s2060_s23 = sphi %s2112_s23, %s2502_s23   ;;  %s2056_s22 = sphi %s2110_s22, %s2501_s22   ;;  %s2052_s21 = sphi %s2108_s21, %s2500_s21  }
   0x4   : > { %s2133_s27 = sadd.s32 1, %s2064_s24   ;;  %s157_s28 = sadd.s32 1, %s2060_s23 }
   0x5   : > { %s154_s29 = ssub.s32 %s2064_s24, %s2133_s27  ;;  %p167_p0 = scmp.ne.s32.totalorder %s2060_s23, %s2056_s22 }
   0x6   : > { %p155_p1 = scmp.eq.s32.totalorder %s154_s29, 0  ;;  %p168_p2 = scmp.eq.s32.totalorder %s2129_s25, 1 }
   0x7   : > { %p173_p3 = scmp.ne.s32.totalorder %s2056_s22, %s2052_s21  ;;  %p174_p4 = scmp.eq.s32.totalorder %s1627_s26, 1 }
   0x8   : > { %s2144_s30 = scalar_select %p155_p1, %s2060_s23, %s157_s28  }
   0x9   : > { %p2146_p5 = por %p168_p2, %p167_p0  ;;  %p2150_p6 = por %p174_p4, %p173_p3 }
   0xa   : > { %p1630_p7 = scmp.ge.s32.totalorder %s2064_s24, 1  ;;  %p216_p8 = scmp.lt.s32.totalorder %s2064_s24, 3 }
   0xc   : > { %p217_p9 = pnand %p1630_p7, %p216_p8 }
   0xd   : > { %s1632_s11 = sshll.u32 (!%p217_p9), %s2129_s25, 2  ;;  %s2067_s16 = smov (!%p217_p9), 64  }
   0xe   : > { %220 = sbr.rel (%p217_p9) target bundleno = 2969 (0xb99), region = 44  ;;  %p247_p10 = scmp.lt.s32.totalorder (!%p217_p9), %s1632_s11, 7 }
   0xf   : > { %s2068_s17 = smov (!%p217_p9), 96   ;;  %s2070_s29 = smov (!%p217_p9), 32  }
  0x10   : > { %s243_s18 = sand.u32 (!%p217_p9), 1, %s2056_s22   ;;  %s1723_s20 = sshll.u32 (!%p217_p9), %s2129_s25, 7 }
  0x11   : > { %s1631_s19 = sshll.u32 (!%p217_p9), %s243_s18, 3  ;;  %s2454_s10 = scalar_lea.hbm (!%p217_p9), %s2497_s6, %s1723_s20 }
  0x13   : > { %v259_v0 = vld [vmem:[%s2492_s1] sm:$0xf]  ;;  %vm267_vm0 = vcmask 1043456   ;;  %s2505_s11 = smov (!%p247_p10, %s1632_s11), 7  ;;  %vm260_vm1 = vcmask 64512   ;;  %v2066_v10 = vmov 0.0  }
  0x14   : > { %1936 = vmatprep.subr.msk.bf16.mxu0 %vm267_vm0, %v259_v0  ;;  %v269_v1 = vsel %vm267_vm0, %v259_v0, 0  ;;  %s1633_s12 = sshll.u32 %s2505_s11, 3  ;;  %1792 = vmatprep.subr.bf16.mxu1 %v2066_v10  ;;  %vm348_vm2 = vcmask 1045504   ;;  %vm324_vm3 = vcmask 1046528   ;;  %vm2069_vm4 = vmmov 0   ;;  %v1986_v48 = vld [vmem:[%s2493_s2 + $0x28] sm:$0xff]  }
  0x15   : > { %1787 = vmatpush3.bf16.msra.mxu0 %v269_v1  ;;  %s250_s15 = scalar_lea.vmem %s2491_s0, %s1633_s12  ;;  %1796 = vmatprep.mubr.msk.bf16.mxu1 %vm2069_vm4, %v2066_v10  ;;  %v1984_v46 = vld [vmem:[%s2495_s4] sm:$0x7f]   ;;  %v1985_v47 = vld [vmem:[%s2495_s4 + $0x8] sm:$0x7f]   ;;  %vm381_vm5 = vcmask 244736   ;;  %v1988_v50 = vld [vmem:[%s2493_s2 + $0x18] sm:$0xff]  }
  0x16   : > { %v253_v2 = vld [vmem:[%s250_s15] sm:$0xff]  ;;  %v254_v3 = vld [vmem:[%s250_s15 + $0x8] sm:$0xff]  ;;  %v255_v4 = vld [vmem:[%s250_s15 + $0x10] sm:$0xff]  ;;  %1800 = vmatprep.subr.bf16.mxu0 %v2066_v10  ;;  %vm504_vm6 = vcmask 261120   ;;  %vm507_vm7 = vcmask 523264   ;;  %vm563_vm8 = vcmask 785408  }
  0x17   : > { %v2165_v5 = vpack.c.bf16 %v254_v3, %v253_v2  ;;  %v256_v6 = vld [vmem:[%s250_s15 + $0x18] sm:$0xff]  ;;  %v1987_v49 = vld [vmem:[%s2493_s2 + $0x20] sm:$0xff]   ;;  %v1989_v51 = vld [vmem:[%s2493_s2 + $0x10] sm:$0xff]   ;;  %vm613_vm9 = vcmask 1044480   ;;  %vm609_vm10 = vcmask 89088   ;;  %vm813_vm11 = vcmask 228352  }
  0x18   : > { %v2167_v7 = vpack.c.bf16 %v256_v6, %v255_v4  ;;  %v1990_v52 = vld [vmem:[%s2493_s2 + $0x8] sm:$0xff]   ;;  %v1991_v53 = vld [vmem:[%s2493_s2] sm:$0xff]   ;;  %vm1034_vm12 = vcmask 1041408   ;;  %vm1030_vm13 = vcmask 31744   ;;  %vm1232_vm14 = vcmask 211968   ;;  %s2072_s11 = smov [#allocation2]  }
  0x19   : > { %1788 = vmatprep.mubr.msk.bf16.mxu0 %vm260_vm1, %v2165_v5  ;;  %v1642_v59 = vld [vmem:[%s2494_s3] ss:$0 sm:$0xff]  ;;  %vm1453_vm15 = vcmask 1040384   ;;  %s2008_s12 = sshll.u32 %s2072_s11, 4  ;;  %s2009_s12 = int_to_ptr.vmem [resolvable:$false] %s2008_s12 }
  0x1a   : > { %1789 = vmatmul.mubr.msk.bf16.vlgmr.msra.gmra.mxu0 %vm260_vm1, %v2167_v7 }
  0x1b   : > { %1804 = vmatprep.mubr.msk.bf16.mxu0 %vm2069_vm4, %v2066_v10 }
  0xda   : > { %v1790_v8 = vpop.f32.mrf.mxu0 }
  0xdb   : > { %v328_v15 = vrot.slane %v1790_v8, 1  ;;  %v352_v16 = vrot.slane %v1790_v8, 2 }
  0xdc   : > { %v305_v9 = vpop.f32.mrf.mxu0 }
  0xdd   : > { %v325_v20 = vrot.slane %v305_v9, 1  ;;  %v349_v24 = vrot.slane %v305_v9, 2 }
  0xde   : > { %v1791_v11 = vpop.f32.mrf.mxu0 }
  0xdf   : > { %v354_v12 = vrot.slane %v1791_v11, 2  ;;  %v330_v13 = vrot.slane %v1791_v11, 1 }
  0xe0   : > { %v308_v14 = vpop.f32.mrf.mxu0 }
  0xe1   : > { %362 = vrot.lane.b32.xlu1 %v354_v12, %s2067_s16  ;;  %338 = vrot.lane.b32.xlu0 %v330_v13, %s2068_s17  ;;  %v326_v17 = vrot.slane %v308_v14, 1  ;;  %v355_v18 = vsel %vm348_vm2, %v352_v16, %v354_v12  ;;  %v331_v19 = vsel %vm324_vm3, %v328_v15, %v330_v13  ;;  %v350_v21 = vrot.slane %v308_v14, 2 }
  0xe3   : > { %v329_v22 = vsel %vm324_vm3, %v326_v17, %v328_v15  ;;  %v327_v23 = vsel %vm324_vm3, %v325_v20, %v326_v17  ;;  %v353_v25 = vsel %vm348_vm2, %v350_v21, %v352_v16  ;;  %v351_v26 = vsel %vm348_vm2, %v349_v24, %v350_v21  ;;  %v1643_v17 = vld [vmem:[%s2494_s3 + $0x1] ss:$0 sm:$0xff] }
  0xe5   : > { %360 = vrot.lane.b32.xlu1 %v355_v18, %s2067_s16  ;;  %336 = vrot.lane.b32.xlu0 %v331_v19, %s2068_s17  ;;  %v2071_v19 = vmov 65535  }
  0xe6   : > { %v614_v20 = vsel %vm613_vm9, 4294967295, %v2071_v19  ;;  %v1992_v19 = vld [vmem:[%s2493_s2 + $0x58] sm:$0xff]  }
  0xe7   : > { %v615_v24 = vsel %vm348_vm2, %v614_v20, 0  ;;  %v1993_v20 = vld [vmem:[%s2493_s2 + $0x50] sm:$0xff]  }
  0xe9   : > { %334 = vrot.lane.b32.xlu1 %v329_v22, %s2068_s17  ;;  %332 = vrot.lane.b32.xlu0 %v327_v23, %s2068_s17 }
  0xed   : > { %358 = vrot.lane.b32.xlu1 %v353_v25, %s2067_s16  ;;  %356 = vrot.lane.b32.xlu0 %v351_v26, %s2067_s16 }
 0x153   : > { %v363_v27 = vpop.permute.xlu1 %362  ;;  %v339_v28 = vpop.permute.xlu0 %338 }
 0x154   : > { %v347_v29 = vadd.f32 %v1791_v11, %v339_v28  ;;  %v608_v28 = vld [vmem:[%s2496_s5] sm:$0xf] }
 0x156   : > { %v371_v33 = vadd.f32 %v363_v27, %v347_v29  ;;  %v1654_v29 = vld [vmem:[%s2492_s1 + $0x4] sm:$0xf] }
 0x157   : > { %v361_v30 = vpop.permute.xlu1 %360  ;;  %v337_v31 = vpop.permute.xlu0 %336 }
 0x158   : > { %v346_v32 = vadd.f32 %v1790_v8, %v337_v31  ;;  %v708_v31 = vsel %vm267_vm0, %v1654_v29, 0 }
 0x15a   : > { %v370_v34 = vadd.f32 %v361_v30, %v346_v32  ;;  %v1652_v30 = vld [vmem:[%s2496_s5 + $0x4] sm:$0xf] }
 0x15b   : > { %v335_v35 = vpop.permute.xlu1 %334  ;;  %v333_v36 = vpop.permute.xlu0 %332 }
 0x15c   : > { %v373_v37 = vpack.c.bf16 %v371_v33, %v370_v34  ;;  %v345_v38 = vadd.f32 %v335_v35, %v308_v14  ;;  %v344_v39 = vadd.f32 %v333_v36, %v305_v9 }
 0x15e   : > { %v386_v40 = vsel %vm324_vm3, %v373_v37, 0 }
 0x15f   : > { %1793 = vmatpush3.bf16.msra.mxu1 %v386_v40  ;;  %1801 = vmatpush3.bf16.msra.mxu0 %v386_v40  ;;  %v359_v41 = vpop.permute.xlu1 %358  ;;  %v357_v42 = vpop.permute.xlu0 %356 }
 0x160   : > { %v369_v43 = vadd.f32 %v359_v41, %v345_v38  ;;  %v368_v44 = vadd.f32 %v357_v42, %v344_v39  ;;  %1794 = vmatprep.subr.bf16.mxu1 %v2066_v10  ;;  %1802 = vmatprep.subr.bf16.mxu0 %v2066_v10 }
 0x162   : > { %v372_v45 = vpack.c.bf16 %v369_v43, %v368_v44 }
 0x164   : > { %1795 = vmatpush3.bf16.msra.mxu1 %v372_v45  ;;  %1803 = vmatpush3.bf16.msra.mxu0 %v372_v45 }
 0x165   : > { %1808 = vmatprep.subr.bf16.mxu1 %v2066_v10  ;;  %1824 = vmatprep.subr.bf16.mxu0 %v2066_v10 }
 0x167   : > { %1797 = vmatmul.mubr.msk.bf16.vlgmr.msra.gmra.mxu1 %vm381_vm5, %v1984_v46  ;;  %1805 = vmatmul.mubr.msk.bf16.vlgmr.msra.gmra.mxu0 %vm381_vm5, %v1985_v47 }
 0x168   : > { %1820 = vmatprep.mubr.msk.bf16.mxu1 %vm2069_vm4, %v2066_v10  ;;  %1826 = vmatprep.mubr.msk.bf16.mxu0 %vm2069_vm4, %v2066_v10 }
 0x169   : > { %1809 = vmatpush3.bf16.msra.mxu1 %v1986_v48 }
 0x16a   : > { %1810 = vmatprep.subr.bf16.mxu1 %v2066_v10 }
 0x16d   : > { %1811 = vmatpush3.bf16.msra.mxu1 %v1987_v49 }
 0x16e   : > { %1812 = vmatprep.subr.bf16.mxu1 %v2066_v10 }
 0x171   : > { %1813 = vmatpush3.bf16.msra.mxu1 %v1988_v50 }
 0x172   : > { %1814 = vmatprep.subr.bf16.mxu1 %v2066_v10 }
 0x175   : > { %1815 = vmatpush3.bf16.msra.mxu1 %v1989_v51 }
 0x176   : > { %1816 = vmatprep.subr.bf16.mxu1 %v2066_v10 }
 0x179   : > { %1817 = vmatpush3.bf16.msra.mxu1 %v1990_v52 }
 0x17a   : > { %1818 = vmatprep.subr.bf16.mxu1 %v2066_v10 }
 0x17d   : > { %1819 = vmatpush3.bf16.msra.mxu1 %v1991_v53 }
 0x17e   : > { %1842 = vmatprep.subr.bf16.mxu1 %v2066_v10 }
 0x227   : > { %v422_v54 = vpop.f32.mrf.mxu1  ;;  %v474_v55 = vpop.f32.mrf.mxu0 }
 0x228   : > { %v481_v58 = vmax.f32 %v422_v54, %v474_v55 }
 0x229   : > { %v1798_v56 = vpop.f32.mrf.mxu1  ;;  %v1806_v57 = vpop.f32.mrf.mxu0 }
 0x22a   : > { %v488_v1 = vadd.f32 %v1642_v59, %v481_v58 }
 0x22b   : > { %v425_v60 = vpop.f32.mrf.mxu1  ;;  %v477_v61 = vpop.f32.mrf.mxu0 }
 0x22c   : > { %v482_v62 = vmax.f32 %v425_v60, %v477_v61 }
 0x22d   : > { %v1799_v63 = vpop.f32.mrf.mxu1  ;;  %v1807_v0 = vpop.f32.mrf.mxu0 }
 0x22e   : > { %v489_v2 = vadd.f32 %v1642_v59, %v482_v62 }
 0x230   : > { %v490_v3 = vpack.c.bf16 %v489_v2, %v488_v1 }
 0x232   : > { %v501_v4 = vrot.slane %v490_v3, 1  ;;  %v494_v6 = vshll.u32 %v490_v3, 16  ;;  %v492_v8 = vshrl.u32 %v490_v3, 16 }
 0x234   : > { %502 = vrot.lane.b32.xlu1 %v501_v4, %s2067_s16  ;;  %v496_v9 = vrot.slane %v494_v6, 1 }
 0x236   : > { %v497_v11 = vor.u32 %v496_v9, %v492_v8 }
 0x238   : > { %498 = vrot.lane.b32.xlu0 %v497_v11, %s2070_s29 }
 0x2a6   : > { %v503_v13 = vpop.permute.xlu1 %502 }
 0x2aa   : > { %v499_v12 = vpop.permute.xlu0 %498 }
 0x2ab   : > { %v506_v14 = vsel %vm504_vm6, %v490_v3, %v499_v12 }
 0x2ac   : > { %v509_v15 = vsel %vm507_vm7, %v506_v14, %v503_v13 }
 0x2ad   : > { %1821 = vmatmul.mubr.msk.bf16.vlgmr.msra.gmra.mxu1 %vm563_vm8, %v509_v15 }
 0x2ae   : > { %1846 = vmatprep.mubr.msk.bf16.mxu1 %vm2069_vm4, %v2066_v10 }
 0x36d   : > { %v600_v16 = vpop.f32.mrf.mxu1 }
 0x36e   : > { %v601_v22 = vadd.f32 %v1643_v17, %v600_v16 }
 0x36f   : > { %v1822_v18 = vpop.f32.mrf.mxu1 }
 0x370   : > { %v1659_v18 = vld [vmem:[%s2495_s4 + $0x18] sm:$0x7] }
 0x371   : > { %v603_v21 = vpop.f32.mrf.mxu1 }
 0x372   : > { %v604_v23 = vadd.f32 %v1643_v17, %v603_v21  ;;  %v1657_v17 = vld [vmem:[%s2495_s4 + $0x10] sm:$0x7]  ;;  %v1994_v21 = vld [vmem:[%s2493_s2 + $0x48] sm:$0xff]  }
 0x373   : > { %v1823_v25 = vpop.f32.mrf.mxu1 }
 0x374   : > { %v607_v26 = vpack.c.bf16 %v604_v23, %v601_v22  ;;  %v1995_v22 = vld [vmem:[%s2493_s2 + $0x40] sm:$0xff]   ;;  %v1996_v23 = vld [vmem:[%s2493_s2 + $0x38] sm:$0xff]  }
 0x376   : > { %v617_v27 = vand.u32 %v615_v24, %v607_v26  ;;  %v1997_v24 = vld [vmem:[%s2493_s2 + $0x30] sm:$0xff]  }
 0x378   : > { %1825 = vmatpush3.bf16.msra.mxu0 %v617_v27 }
 0x379   : > { %1830 = vmatprep.subr.bf16.mxu0 %v2066_v10 }
 0x37b   : > { %1827 = vmatmul.mubr.msk.bf16.vlgmr.msra.gmra.mxu0 %vm609_vm10, %v608_v28 }
 0x37c   : > { %1831 = vmatpush3.bf16.msra.mxu0 %v617_v27  ;;  %1832 = vmatprep.mubr.msk.bf16.mxu0 %vm2069_vm4, %v2066_v10  ;;  %v1662_v27 = vld [vmem:[%s2494_s3 + $0x2] ss:$0 sm:$0xff] }
 0x37d   : > { %1937 = vmatprep.subr.msk.bf16.mxu0 %vm267_vm0, %v1654_v29 }
 0x383   : > { %1833 = vmatmul.mubr.msk.bf16.vlgmr.msra.gmra.mxu0 %vm609_vm10, %v1652_v30 }
 0x384   : > { %1837 = vmatpush3.bf16.msra.mxu0 %v708_v31  ;;  %1838 = vmatprep.mubr.msk.bf16.mxu0 %vm260_vm1, %v2165_v5 }
 0x385   : > { %1850 = vmatprep.subr.bf16.mxu0 %v2066_v10 }
 0x38b   : > { %1839 = vmatmul.mubr.msk.bf16.vlgmr.msra.gmra.mxu0 %vm260_vm1, %v2167_v7 }
 0x38c   : > { %1854 = vmatprep.mubr.msk.bf16.mxu0 %vm2069_vm4, %v2066_v10 }
 0x43b   : > { %v2268_v32 = vpop.f32.mrf.mxu0 }
 0x43d   : > { %v1828_v33 = vpop.f32.mrf.mxu0 }
 0x43f   : > { %v656_v34 = vpop.f32.mrf.mxu0 }
 0x441   : > { %v1829_v35 = vpop.f32.mrf.mxu0 }
 0x443   : > { %v2270_v36 = vpop.f32.mrf.mxu0 }
 0x444   : > { %v704_v37 = vmax.f32 %v2268_v32, %v2270_v36 }
 0x445   : > { %v1834_v38 = vpop.f32.mrf.mxu0 }
 0x447   : > { %v701_v39 = vpop.f32.mrf.mxu0 }
 0x449   : > { %v1835_v40 = vpop.f32.mrf.mxu0 }
 0x44b   : > { %v1840_v41 = vpop.f32.mrf.mxu0 }
 0x44c   : > { %v766_v44 = vrot.slane %v1840_v41, 2  ;;  %v789_v49 = vrot.slane %v1840_v41, 4 }
 0x44d   : > { %v744_v42 = vpop.f32.mrf.mxu0 }
 0x44e   : > { %v763_v52 = vrot.slane %v744_v42, 2  ;;  %v786_v56 = vrot.slane %v744_v42, 4 }
 0x44f   : > { %v1841_v43 = vpop.f32.mrf.mxu0 }
 0x450   : > { %v768_v45 = vrot.slane %v1841_v43, 2  ;;  %v791_v46 = vrot.slane %v1841_v43, 4 }
 0x451   : > { %v747_v47 = vpop.f32.mrf.mxu0 }
 0x452   : > { %776 = vrot.lane.b32.xlu1 %v768_v45, %s2068_s17  ;;  %v769_v48 = vsel %vm348_vm2, %v766_v44, %v768_v45  ;;  %v764_v50 = vrot.slane %v747_v47, 2  ;;  %v792_v51 = vsel %vm267_vm0, %v789_v49, %v791_v46  ;;  %v787_v53 = vrot.slane %v747_v47, 4 }
 0x453   : > { %774 = vrot.lane.b32.xlu0 %v769_v48, %s2068_s17 }
 0x454   : > { %v767_v54 = vsel %vm348_vm2, %v764_v50, %v766_v44  ;;  %v765_v55 = vsel %vm348_vm2, %v763_v52, %v764_v50  ;;  %v790_v57 = vsel %vm267_vm0, %v787_v53, %v789_v49  ;;  %v788_v58 = vsel %vm267_vm0, %v786_v56, %v787_v53  ;;  %v1676_v49 = vld [vmem:[%s2494_s3 + $0x3] ss:$0 sm:$0xff] }
 0x456   : > { %799 = vrot.lane.b32.xlu1 %v791_v46, %s2067_s16 }
 0x457   : > { %797 = vrot.lane.b32.xlu0 %v792_v51, %s2067_s16 }
 0x45a   : > { %772 = vrot.lane.b32.xlu1 %v767_v54, %s2068_s17 }
 0x45b   : > { %770 = vrot.lane.b32.xlu0 %v765_v55, %s2068_s17 }
 0x45e   : > { %795 = vrot.lane.b32.xlu1 %v790_v57, %s2067_s16  ;;  %v1684_v57 = vld [vmem:[%s2496_s5 + $0x8] sm:$0xf] }
 0x45f   : > { %793 = vrot.lane.b32.xlu0 %v788_v58, %s2067_s16  ;;  %v1688_v58 = vld [vmem:[%s2492_s1 + $0x8] sm:$0xf] }
 0x4c4   : > { %v777_v59 = vpop.permute.xlu1 %776 }
 0x4c5   : > { %v775_v60 = vpop.permute.xlu0 %774  ;;  %v785_v61 = vadd.f32 %v1841_v43, %v777_v59  ;;  %v1686_v59 = vld [vmem:[%s2496_s5 + $0xc] sm:$0xf] }
 0x4c6   : > { %v784_v62 = vadd.f32 %v1840_v41, %v775_v60  ;;  %v1127_v60 = vsel %vm267_vm0, %v1688_v58, 0 }
 0x4c8   : > { %v800_v63 = vpop.permute.xlu1 %799 }
 0x4c9   : > { %v808_v0 = vadd.f32 %v800_v63, %v785_v61  ;;  %v798_v1 = vpop.permute.xlu0 %797 }
 0x4ca   : > { %v807_v2 = vadd.f32 %v798_v1, %v784_v62 }
 0x4cc   : > { %v810_v3 = vpack.c.bf16 %v808_v0, %v807_v2  ;;  %v773_v4 = vpop.permute.xlu1 %772 }
 0x4cd   : > { %v771_v6 = vpop.permute.xlu0 %770  ;;  %v783_v9 = vadd.f32 %v773_v4, %v747_v47 }
 0x4ce   : > { %v818_v8 = vsel %vm348_vm2, %v810_v3, 0  ;;  %v782_v11 = vadd.f32 %v771_v6, %v744_v42 }
 0x4cf   : > { %1843 = vmatpush3.bf16.msra.mxu1 %v818_v8  ;;  %1851 = vmatpush3.bf16.msra.mxu0 %v818_v8 }
 0x4d0   : > { %v796_v12 = vpop.permute.xlu1 %795  ;;  %1844 = vmatprep.subr.bf16.mxu1 %v2066_v10  ;;  %1852 = vmatprep.subr.bf16.mxu0 %v2066_v10 }
 0x4d1   : > { %v806_v13 = vadd.f32 %v796_v12, %v783_v9  ;;  %v794_v14 = vpop.permute.xlu0 %793 }
 0x4d2   : > { %v805_v15 = vadd.f32 %v794_v14, %v782_v11 }
 0x4d4   : > { %v809_v16 = vpack.c.bf16 %v806_v13, %v805_v15 }
 0x4d6   : > { %1845 = vmatpush3.bf16.msra.mxu1 %v809_v16  ;;  %1853 = vmatpush3.bf16.msra.mxu0 %v809_v16 }
 0x4d7   : > { %1858 = vmatprep.subr.bf16.mxu1 %v2066_v10  ;;  %1874 = vmatprep.subr.bf16.mxu0 %v2066_v10 }
 0x4d9   : > { %1847 = vmatmul.mubr.msk.bf16.vlgmr.msra.gmra.mxu1 %vm813_vm11, %v1657_v17  ;;  %1855 = vmatmul.mubr.msk.bf16.vlgmr.msra.gmra.mxu0 %vm813_vm11, %v1659_v18 }
 0x4da   : > { %1870 = vmatprep.mubr.msk.bf16.mxu1 %vm2069_vm4, %v2066_v10  ;;  %1876 = vmatprep.mubr.msk.bf16.mxu0 %vm2069_vm4, %v2066_v10 }
 0x4db   : > { %1859 = vmatpush3.bf16.msra.mxu1 %v1992_v19 }
 0x4dc   : > { %1860 = vmatprep.subr.bf16.mxu1 %v2066_v10 }
 0x4df   : > { %1861 = vmatpush3.bf16.msra.mxu1 %v1993_v20 }
 0x4e0   : > { %1862 = vmatprep.subr.bf16.mxu1 %v2066_v10 }
 0x4e3   : > { %1863 = vmatpush3.bf16.msra.mxu1 %v1994_v21 }
 0x4e4   : > { %1864 = vmatprep.subr.bf16.mxu1 %v2066_v10 }
 0x4e7   : > { %1865 = vmatpush3.bf16.msra.mxu1 %v1995_v22 }
 0x4e8   : > { %1866 = vmatprep.subr.bf16.mxu1 %v2066_v10 }
 0x4eb   : > { %1867 = vmatpush3.bf16.msra.mxu1 %v1996_v23 }
 0x4ec   : > { %1868 = vmatprep.subr.bf16.mxu1 %v2066_v10 }
 0x4ef   : > { %1869 = vmatpush3.bf16.msra.mxu1 %v1997_v24 }
 0x4f0   : > { %1892 = vmatprep.subr.bf16.mxu1 %v2066_v10 }
 0x599   : > { %v854_v25 = vpop.f32.mrf.mxu1  ;;  %v899_v26 = vpop.f32.mrf.mxu0 }
 0x59a   : > { %v905_v28 = vmax.f32 %v854_v25, %v899_v26 }
 0x59b   : > { %v1848_v29 = vpop.f32.mrf.mxu1  ;;  %v1856_v30 = vpop.f32.mrf.mxu0 }
 0x59c   : > { %v912_v31 = vadd.f32 %v1662_v27, %v905_v28 }
 0x59d   : > { %v857_v33 = vpop.f32.mrf.mxu1  ;;  %v902_v34 = vpop.f32.mrf.mxu0 }
 0x59e   : > { %v913_v35 = vpack.c.bf16 %v912_v31, %v912_v31 }
 0x59f   : > { %v1849_v38 = vpop.f32.mrf.mxu1  ;;  %v1857_v39 = vpop.f32.mrf.mxu0 }
 0x5a0   : > { %v924_v40 = vrot.slane %v913_v35, 1  ;;  %v917_v41 = vshll.u32 %v913_v35, 16  ;;  %v915_v42 = vshrl.u32 %v913_v35, 16 }
 0x5a2   : > { %925 = vrot.lane.b32.xlu1 %v924_v40, %s2067_s16  ;;  %v919_v43 = vrot.slane %v917_v41, 1 }
 0x5a4   : > { %v920_v44 = vor.u32 %v919_v43, %v915_v42 }
 0x5a6   : > { %921 = vrot.lane.b32.xlu0 %v920_v44, %s2070_s29 }
 0x614   : > { %v926_v46 = vpop.permute.xlu1 %925 }
 0x618   : > { %v922_v45 = vpop.permute.xlu0 %921 }
 0x619   : > { %v928_v47 = vsel %vm504_vm6, %v913_v35, %v922_v45 }
 0x61a   : > { %v930_v48 = vsel %vm507_vm7, %v928_v47, %v926_v46  ;;  %v1691_v47 = vld [vmem:[%s2495_s4 + $0x20] sm:$0x3] }
 0x61b   : > { %1871 = vmatmul.mubr.msk.bf16.vlgmr.msra.gmra.mxu1 %vm563_vm8, %v930_v48  ;;  %v1693_v48 = vld [vmem:[%s2495_s4 + $0x28] sm:$0x3] }
 0x61c   : > { %1896 = vmatprep.mubr.msk.bf16.mxu1 %vm2069_vm4, %v2066_v10 }
 0x6db   : > { %v1021_v50 = vpop.f32.mrf.mxu1 }
 0x6dc   : > { %v1022_v51 = vadd.f32 %v1676_v49, %v1021_v50  ;;  %v1998_v49 = vld [vmem:[%s2493_s2 + $0x88] sm:$0xff]   ;;  %v1999_v50 = vld [vmem:[%s2493_s2 + $0x80] sm:$0xff]  }
 0x6dd   : > { %v1872_v52 = vpop.f32.mrf.mxu1 }
 0x6de   : > { %v1027_v53 = vpack.c.bf16 %v1022_v51, %v1022_v51  ;;  %v2000_v51 = vld [vmem:[%s2493_s2 + $0x78] sm:$0xff]   ;;  %v2001_v52 = vld [vmem:[%s2493_s2 + $0x70] sm:$0xff]  }
 0x6df   : > { %v1024_v54 = vpop.f32.mrf.mxu1 }
 0x6e0   : > { %v1036_v55 = vsel %vm1034_vm12, %v1027_v53, 0  ;;  %v2002_v53 = vld [vmem:[%s2493_s2 + $0x68] sm:$0xff]   ;;  %v2003_v54 = vld [vmem:[%s2493_s2 + $0x60] sm:$0xff]  }
 0x6e1   : > { %v1873_v56 = vpop.f32.mrf.mxu1  ;;  %1875 = vmatpush3.bf16.msra.mxu0 %v1036_v55 }
 0x6e2   : > { %1880 = vmatprep.subr.bf16.mxu0 %v2066_v10 }
 0x6e4   : > { %1877 = vmatmul.mubr.msk.bf16.vlgmr.msra.gmra.mxu0 %vm1030_vm13, %v1684_v57  ;;  %v1696_v57 = vld [vmem:[%s2494_s3 + $0x4] ss:$0 sm:$0xff] }
 0x6e5   : > { %1881 = vmatpush3.bf16.msra.mxu0 %v1036_v55  ;;  %1882 = vmatprep.mubr.msk.bf16.mxu0 %vm2069_vm4, %v2066_v10 }
 0x6e6   : > { %1938 = vmatprep.subr.msk.bf16.mxu0 %vm267_vm0, %v1688_v58  ;;  %vm1449_vm0 = vcmask 15360  }
 0x6ec   : > { %1883 = vmatmul.mubr.msk.bf16.vlgmr.msra.gmra.mxu0 %vm1030_vm13, %v1686_v59 }
 0x6ed   : > { %1887 = vmatpush3.bf16.msra.mxu0 %v1127_v60  ;;  %1888 = vmatprep.mubr.msk.bf16.mxu0 %vm260_vm1, %v2165_v5 }
 0x6ee   : > { %1900 = vmatprep.subr.bf16.mxu0 %v2066_v10 }
 0x6f4   : > { %1889 = vmatmul.mubr.msk.bf16.vlgmr.msra.gmra.mxu0 %vm260_vm1, %v2167_v7 }
 0x6f5   : > { %1904 = vmatprep.mubr.msk.bf16.mxu0 %vm2069_vm4, %v2066_v10 }
 0x7a4   : > { %v2362_v61 = vpop.f32.mrf.mxu0 }
 0x7a6   : > { %v1878_v62 = vpop.f32.mrf.mxu0 }
 0x7a8   : > { %v1075_v63 = vpop.f32.mrf.mxu0 }
 0x7aa   : > { %v1879_v0 = vpop.f32.mrf.mxu0 }
 0x7ac   : > { %v2364_v1 = vpop.f32.mrf.mxu0 }
 0x7ad   : > { %v1123_v2 = vmax.f32 %v2362_v61, %v2364_v1 }
 0x7ae   : > { %v1884_v3 = vpop.f32.mrf.mxu0 }
 0x7b0   : > { %v1120_v5 = vpop.f32.mrf.mxu0 }
 0x7b2   : > { %v1885_v4 = vpop.f32.mrf.mxu0 }
 0x7b4   : > { %v1890_v6 = vpop.f32.mrf.mxu0 }
 0x7b5   : > { %v1185_v7 = vrot.slane %v1890_v6, 3  ;;  %v1208_v15 = vrot.slane %v1890_v6, 6 }
 0x7b6   : > { %v1163_v8 = vpop.f32.mrf.mxu0 }
 0x7b7   : > { %v1182_v18 = vrot.slane %v1163_v8, 3  ;;  %v1205_v22 = vrot.slane %v1163_v8, 6 }
 0x7b8   : > { %v1891_v9 = vpop.f32.mrf.mxu0 }
 0x7b9   : > { %v1187_v11 = vrot.slane %v1891_v9, 3  ;;  %v1210_v12 = vrot.slane %v1891_v9, 6 }
 0x7ba   : > { %v1166_v13 = vpop.f32.mrf.mxu0 }
 0x7bb   : > { %1195 = vrot.lane.b32.xlu1 %v1187_v11, %s2068_s17  ;;  %v1188_v14 = vsel %vm613_vm9, %v1185_v7, %v1187_v11  ;;  %v1183_v16 = vrot.slane %v1166_v13, 3  ;;  %v1211_v17 = vsel %vm1034_vm12, %v1208_v15, %v1210_v12  ;;  %v1206_v19 = vrot.slane %v1166_v13, 6 }
 0x7bc   : > { %1193 = vrot.lane.b32.xlu0 %v1188_v14, %s2068_s17 }
 0x7bd   : > { %v1186_v20 = vsel %vm613_vm9, %v1183_v16, %v1185_v7  ;;  %v1184_v21 = vsel %vm613_vm9, %v1182_v18, %v1183_v16  ;;  %v1209_v23 = vsel %vm1034_vm12, %v1206_v19, %v1208_v15  ;;  %v1207_v24 = vsel %vm1034_vm12, %v1205_v22, %v1206_v19  ;;  %v1710_v16 = vld [vmem:[%s2494_s3 + $0x5] ss:$0 sm:$0xff]  ;;  %v1720_v22 = vld [vmem:[%s2496_s5 + $0x14] sm:$0xf] }
 0x7bf   : > { %1218 = vrot.lane.b32.xlu1 %v1210_v12, %s2067_s16 }
 0x7c0   : > { %1216 = vrot.lane.b32.xlu0 %v1211_v17, %s2067_s16 }
 0x7c3   : > { %1191 = vrot.lane.b32.xlu1 %v1186_v20, %s2068_s17 }
 0x7c4   : > { %1189 = vrot.lane.b32.xlu0 %v1184_v21, %s2068_s17  ;;  %s245_s17 = scalar_lea.vmem [#allocation2], %s1631_s19 }
 0x7c5   : > { %s1568_s26 = sshll.u32 %s245_s17, 4  ;;  %s1569_s26 = int_to_ptr.vmem [resolvable:$true] %s1568_s26 }
 0x7c6   : > { %s2004_s25 = scalar_lea.vmem %s1569_s26, 128  ;;  %p2011_p0 = scmp.lt.s32.totalorder %s1569_s26, %s2009_s12 }
 0x7c7   : > { %1214 = vrot.lane.b32.xlu1 %v1209_v23, %s2067_s16  ;;  %p2005_p11 = scmp.ne.s32.totalorder %s1569_s26, %s2004_s25 }
 0x7c8   : > { %1212 = vrot.lane.b32.xlu0 %v1207_v24, %s2067_s16 }
 0x7c9   : > { %p2006_p12 = pnand %p2005_p11, %p2146_p5 }
 0x7cb   : > { %p2007_p13 = pneg %p2006_p12 }
 0x82d   : > { %v1196_v25 = vpop.permute.xlu1 %1195 }
 0x82e   : > { %v1194_v26 = vpop.permute.xlu0 %1193  ;;  %v1204_v27 = vadd.f32 %v1891_v9, %v1196_v25 }
 0x82f   : > { %v1203_v28 = vadd.f32 %v1890_v6, %v1194_v26 }
 0x831   : > { %v1219_v29 = vpop.permute.xlu1 %1218 }
 0x832   : > { %v1227_v30 = vadd.f32 %v1219_v29, %v1204_v27  ;;  %v1217_v31 = vpop.permute.xlu0 %1216 }
 0x833   : > { %v1226_v33 = vadd.f32 %v1217_v31, %v1203_v28 }
 0x835   : > { %v1229_v34 = vpack.c.bf16 %v1227_v30, %v1226_v33  ;;  %v1192_v35 = vpop.permute.xlu1 %1191 }
 0x836   : > { %v1190_v38 = vpop.permute.xlu0 %1189  ;;  %v1202_v40 = vadd.f32 %v1192_v35, %v1166_v13 }
 0x837   : > { %v1237_v39 = vsel %vm613_vm9, %v1229_v34, 0  ;;  %v1201_v41 = vadd.f32 %v1190_v38, %v1163_v8 }
 0x838   : > { %1893 = vmatpush3.bf16.msra.mxu1 %v1237_v39  ;;  %1901 = vmatpush3.bf16.msra.mxu0 %v1237_v39 }
 0x839   : > { %v1215_v42 = vpop.permute.xlu1 %1214  ;;  %1894 = vmatprep.subr.bf16.mxu1 %v2066_v10  ;;  %1902 = vmatprep.subr.bf16.mxu0 %v2066_v10 }
 0x83a   : > { %v1225_v43 = vadd.f32 %v1215_v42, %v1202_v40  ;;  %v1213_v44 = vpop.permute.xlu0 %1212 }
 0x83b   : > { %v1224_v45 = vadd.f32 %v1213_v44, %v1201_v41 }
 0x83d   : > { %v1228_v46 = vpack.c.bf16 %v1225_v43, %v1224_v45 }
 0x83f   : > { %1895 = vmatpush3.bf16.msra.mxu1 %v1228_v46  ;;  %1903 = vmatpush3.bf16.msra.mxu0 %v1228_v46 }
 0x840   : > { %1908 = vmatprep.subr.bf16.mxu1 %v2066_v10  ;;  %1924 = vmatprep.subr.bf16.mxu0 %v2066_v10 }
 0x842   : > { %1897 = vmatmul.mubr.msk.bf16.vlgmr.msra.gmra.mxu1 %vm1232_vm14, %v1691_v47  ;;  %1905 = vmatmul.mubr.msk.bf16.vlgmr.msra.gmra.mxu0 %vm1232_vm14, %v1693_v48 }
 0x843   : > { %1920 = vmatprep.mubr.msk.bf16.mxu1 %vm2069_vm4, %v2066_v10  ;;  %1926 = vmatprep.mubr.msk.bf16.mxu0 %vm2069_vm4, %v2066_v10 }
 0x844   : > { %1909 = vmatpush3.bf16.msra.mxu1 %v1998_v49 }
 0x845   : > { %1910 = vmatprep.subr.bf16.mxu1 %v2066_v10 }
 0x848   : > { %1911 = vmatpush3.bf16.msra.mxu1 %v1999_v50 }
 0x849   : > { %1912 = vmatprep.subr.bf16.mxu1 %v2066_v10 }
 0x84c   : > { %1913 = vmatpush3.bf16.msra.mxu1 %v2000_v51 }
 0x84d   : > { %1914 = vmatprep.subr.bf16.mxu1 %v2066_v10 }
 0x850   : > { %1915 = vmatpush3.bf16.msra.mxu1 %v2001_v52 }
 0x851   : > { %1916 = vmatprep.subr.bf16.mxu1 %v2066_v10 }
 0x854   : > { %1917 = vmatpush3.bf16.msra.mxu1 %v2002_v53 }
 0x855   : > { %1918 = vmatprep.subr.bf16.mxu1 %v2066_v10 }
 0x858   : > { %1919 = vmatpush3.bf16.msra.mxu1 %v2003_v54 }
 0x902   : > { %v1273_v55 = vpop.f32.mrf.mxu1  ;;  %v1318_v56 = vpop.f32.mrf.mxu0 }
 0x903   : > { %v1324_v58 = vmax.f32 %v1273_v55, %v1318_v56 }
 0x904   : > { %v1898_v59 = vpop.f32.mrf.mxu1  ;;  %v1906_v60 = vpop.f32.mrf.mxu0 }
 0x905   : > { %v1331_v62 = vadd.f32 %v1696_v57, %v1324_v58 }
 0x906   : > { %v1276_v63 = vpop.f32.mrf.mxu1  ;;  %v1321_v0 = vpop.f32.mrf.mxu0 }
 0x907   : > { %v1332_v3 = vpack.c.bf16 %v1331_v62, %v1331_v62 }
 0x908   : > { %v1899_v5 = vpop.f32.mrf.mxu1  ;;  %v1907_v4 = vpop.f32.mrf.mxu0 }
 0x909   : > { %v1343_v6 = vrot.slane %v1332_v3, 1  ;;  %v1336_v8 = vshll.u32 %v1332_v3, 16  ;;  %v1334_v9 = vshrl.u32 %v1332_v3, 16 }
 0x90b   : > { %1344 = vrot.lane.b32.xlu1 %v1343_v6, %s2067_s16  ;;  %v1338_v7 = vrot.slane %v1336_v8, 1 }
 0x90d   : > { %v1339_v11 = vor.u32 %v1338_v7, %v1334_v9 }
 0x90f   : > { %1340 = vrot.lane.b32.xlu0 %v1339_v11, %s2070_s29 }
 0x913   : > { %1544 = vrot.lane.b32.xlu0 %v1123_v2, %s2070_s29  ;;  %v1718_v2 = vld [vmem:[%s2496_s5 + $0x10] sm:$0xf]  ;;  %s2010_s29 = scalar_lea.vmem %s2009_s12, 256 }
 0x914   : > { %p2012_p1 = scmp.lt.s32.totalorder %s2010_s29, %s2004_s25 }
 0x916   : > { %p2013_p2 = por %p2012_p1, %p2011_p0 }
 0x918   : > { %p2014_p3 = pnand %p2013_p2, %p2007_p13 }
 0x97d   : > { %v1345_v13 = vpop.permute.xlu1 %1344 }
 0x981   : > { %v1341_v12 = vpop.permute.xlu0 %1340 }
 0x982   : > { %v1347_v14 = vsel %vm504_vm6, %v1332_v3, %v1341_v12 }
 0x983   : > { %v1349_v15 = vsel %vm507_vm7, %v1347_v14, %v1345_v13 }
 0x984   : > { %1921 = vmatmul.mubr.msk.bf16.vlgmr.msra.gmra.mxu1 %vm563_vm8, %v1349_v15 }
 0xa44   : > { %v1440_v17 = vpop.f32.mrf.mxu1 }
 0xa45   : > { %v1441_v18 = vadd.f32 %v1710_v16, %v1440_v17 }
 0xa46   : > { %v1922_v19 = vpop.f32.mrf.mxu1 }
 0xa47   : > { %v1446_v20 = vpack.c.bf16 %v1441_v18, %v1441_v18 }
 0xa48   : > { %v1443_v21 = vpop.f32.mrf.mxu1 }
 0xa49   : > { %v1455_v61 = vsel %vm1453_vm15, %v1446_v20, 0 }
 0xa4a   : > { %v1923_v1 = vpop.f32.mrf.mxu1  ;;  %1925 = vmatpush3.bf16.msra.mxu0 %v1455_v61 }
 0xa4b   : > { %1930 = vmatprep.subr.bf16.mxu0 %v2066_v10 }
 0xa4d   : > { %1927 = vmatmul.mubr.msk.bf16.vlgmr.msra.gmra.mxu0 %vm1449_vm0, %v1718_v2 }
 0xa4e   : > { %1931 = vmatpush3.bf16.msra.mxu0 %v1455_v61  ;;  %1932 = vmatprep.mubr.msk.bf16.mxu0 %vm2069_vm4, %v2066_v10  ;;  %v1545_v10 = vpop.permute.xlu0 %1544 }
 0xa4f   : > { %v1551_v33 = vsel %vm504_vm6, %v704_v37, %v1545_v10 }
 0xa55   : > { %1933 = vmatmul.mubr.msk.bf16.vlgmr.msra.gmra.mxu0 %vm1449_vm0, %v1720_v22 }
 0xb0d   : > { %v1491_v23 = vpop.f32.mrf.mxu0 }
 0xb0f   : > { %v1928_v24 = vpop.f32.mrf.mxu0 }
 0xb11   : > { %v1494_v25 = vpop.f32.mrf.mxu0 }
 0xb13   : > { %v1929_v26 = vpop.f32.mrf.mxu0 }
 0xb15   : > { %v1536_v27 = vpop.f32.mrf.mxu0 }
 0xb16   : > { %v1542_v28 = vmax.f32 %v1491_v23, %v1536_v27 }
 0xb17   : > { %v1934_v29 = vpop.f32.mrf.mxu0 }
 0xb18   : > { %1548 = vrot.lane.b32.xlu1 %v1542_v28, %s2067_s16  ;;  %s1555_s16 = scalar_lea.sflag [#allocation3], %s243_s18 }
 0xb19   : > { %v1539_v30 = vpop.f32.mrf.mxu0 }
 0xb1b   : > { %v1935_v31 = vpop.f32.mrf.mxu0 }
 0xb8a   : > { %v1549_v34 = vpop.permute.xlu1 %1548 }
 0xb8b   : > { %v1552_v35 = vsel %vm507_vm7, %v1551_v33, %v1549_v34 }
 0xb8c   : > { %1553 = vst.msk [vmem:[%s245_s17] sm:$0xff] %vm563_vm8, %v1552_v35 }
 0xb8d   : > { %2017 = shalt.err (!%p2014_p3)
}
 0xb8e   : > { %s2018_s13 = scalar_lea.hbm %s2454_s10, 128  ;;  %s2022_s18 = scalar_lea.hbm %s2497_s6, 256 }
 0xb8f   : > { %p2019_p4 = scmp.ne.s32.totalorder %s2454_s10, %s2018_s13  ;;  %p2023_p9 = scmp.lt.s32.totalorder %s2454_s10, %s2497_s6 }
 0xb90   : > { %p2024_p10 = scmp.lt.s32.totalorder %s2022_s18, %s2018_s13 }
 0xb91   : > { %p2020_p7 = pnand %p2019_p4, %p2146_p5 }
 0xb92   : > { %p2025_p11 = por %p2024_p10, %p2023_p9 }
 0xb93   : > { %p2021_p8 = pneg %p2020_p7 }
 0xb95   : > { %p2026_p12 = pnand %p2025_p11, %p2021_p8 }
 0xb97   : > { %2029 = shalt.err (!%p2026_p12)
}
 0xb98   : > { %1939 = dma.vmem_to_hbm [thread:$0]  (%p2146_p5), %s1569_s26, 128, %s2454_s10, %s1555_s16  }
 0xb99 PF: > { %p1945_p13 = scmp.ge.s32.totalorder %s2064_s24, 2  ;;  %s1580_s17 = sand.u32 1, %s2052_s21  }
 0xb9a   : > { %s1581_s28 = scalar_lea.sflag [#allocation3], %s1580_s17 }
 0xb9b   : > { %p1942_p0 = pnand %p1945_p13, %p2150_p6 }
 0xb9d   : > { %p1943_p1 = pneg %p1942_p0 }
 0xb9f   : > { %2047 = dma.done.wait (%p1943_p1), %s1581_s28, 128  }
 0xba0   : > { %2049 = vsyncadd (%p1943_p1), %s1581_s28, 4294967168  ;;  %p16_p2 = scmp.ge.s32.totalorder %s2133_s27, 4   ;;  %s2500_s21 = smov %s2056_s22 }
 0xba1   : > { %s2501_s22 = smov %s2060_s23  ;;  %s2502_s23 = smov %s2144_s30 }
 0xba2   : > { %s2503_s24 = smov %s2133_s27  ;;  %18 = sbr.rel (!%p16_p2) target bundleno = 3 (0x3), region = 95 }
 0xba7   :  { %1586 = vsyncpa [#allocation3], 1 }
 0xba8   :  { %1588 = vsyncpa [#allocation3 + $0x1], 1 }

</bundles_post_ra>
